<compile_context>
chip_gen: v7x
topology: tpu7x:2x2x1
jax: 0.10.0
libtpu: 0.0.40
codegen_flags: <defaults>
</compile_context>

<pallas_src>
import jax
import jax.numpy as jnp
import numpy as np
from jax.experimental import pallas as pl
from jax.experimental.pallas import tpu as pltpu

VOCAB = 64          # args.vocab_size
WORD_DIM = 128      # fixed inner word-embedding width in the module
HIDDEN = 128        # args.hidden_size
MAX_POS = 16        # args.max_position_embeddings
NUM_TYPES = 3
EPS = 1e-12


def embeddings_kernel(ids_ref, seg_ref, pos_ref,                 # (N,1) int32
                      wtab_ref, proj_ref, ptab_ref, ttab_ref,    # tables (VMEM)
                      gamma_ref, beta_ref,                       # (1,H)
                      out_ref):                                  # (N,H)
    n = out_ref.shape[0]
    vocab = wtab_ref.shape[0]
    max_pos = ptab_ref.shape[0]

    ids = ids_ref[...]          # (n, 1) int32
    seg = seg_ref[...]
    pos = pos_ref[...]

    # Word embedding: one-hot row gather on the MXU, then 128 -> H projection.
    # (padding row 0 of the table is zero; out-of-range ids yield a zero row.)
    word_oh = (ids == jax.lax.broadcasted_iota(jnp.int32, (n, vocab), 1)
               ).astype(jnp.float32)                                   # (n, vocab)
    w = jnp.dot(word_oh, wtab_ref[...], preferred_element_type=jnp.float32)
    w = jnp.dot(w, proj_ref[...], preferred_element_type=jnp.float32)  # (n, H)

    # Positional embedding: one-hot gather (supports arbitrary position_ids).
    pos_oh = (pos == jax.lax.broadcasted_iota(jnp.int32, (n, max_pos), 1)
              ).astype(jnp.float32)                                    # (n, max_pos)
    p = jnp.dot(pos_oh, ptab_ref[...], preferred_element_type=jnp.float32)

    # Type embedding: only 3 rows -> branch-free VPU select (no tiny-K matmul).
    t0 = ttab_ref[0:1, :]
    t1 = ttab_ref[1:2, :]
    t2 = ttab_ref[2:3, :]
    t = jnp.where(seg == 0, t0, jnp.where(seg == 1, t1, t2))           # (n, H)

    x = w + p + t

    # LayerNorm over the hidden axis (eps = 1e-12), elementwise affine.
    mean = jnp.mean(x, axis=-1, keepdims=True)
    var = jnp.mean(jnp.square(x - mean), axis=-1, keepdims=True)
    y = (x - mean) * jax.lax.rsqrt(var + EPS)
    out_ref[...] = (y * gamma_ref[...] + beta_ref[...]).astype(out_ref.dtype)


def embeddings_forward(input_ids, segment_ids, word_table, proj, pos_table,
                       type_table, gamma, beta, position_ids=None):
    B, S = input_ids.shape
    H = proj.shape[1]
    if position_ids is None:
        # torch.arange(self.len).unsqueeze(0).expand_as(input_ids) requires
        # S == max_position_embeddings.
        assert S == pos_table.shape[0], (
            "default position_ids requires S == max_position_embeddings")
        position_ids = jnp.broadcast_to(
            jnp.arange(S, dtype=jnp.int32)[None, :], (B, S))

    gamma2d = gamma.reshape(1, H)
    beta2d = beta.reshape(1, H)

    # Flatten tokens and pad the token axis up to a sublane multiple (8).
    n_tok = B * S
    n_pad = (-n_tok) % 8
    n = n_tok + n_pad

    def prep(a):
        a = a.reshape(n_tok).astype(jnp.int32)
        if n_pad:
            a = jnp.pad(a, (0, n_pad))          # padded rows: id/seg/pos = 0
        return a.reshape(n, 1)

    ids2d = prep(input_ids)
    seg2d = prep(segment_ids)
    pos2d = prep(position_ids)

    out = pl.pallas_call(
        embeddings_kernel,
        out_shape=jax.ShapeDtypeStruct((n, H), jnp.float32),
        grid=(1,),
        in_specs=[
            pl.BlockSpec((n, 1),            lambda i: (0, 0)),
            pl.BlockSpec((n, 1),            lambda i: (0, 0)),
            pl.BlockSpec((n, 1),            lambda i: (0, 0)),
            pl.BlockSpec(word_table.shape,  lambda i: (0, 0)),
            pl.BlockSpec(proj.shape,        lambda i: (0, 0)),
            pl.BlockSpec(pos_table.shape,   lambda i: (0, 0)),
            pl.BlockSpec(type_table.shape,  lambda i: (0, 0)),
            pl.BlockSpec((1, H),            lambda i: (0, 0)),
            pl.BlockSpec((1, H),            lambda i: (0, 0)),
        ],
        out_specs=pl.BlockSpec((n, H), lambda i: (0, 0)),
        compiler_params=pltpu.CompilerParams(
            dimension_semantics=("arbitrary",)),
    )(ids2d, seg2d, pos2d, word_table, proj, pos_table, type_table,
      gamma2d, beta2d)
    return out[:n_tok].reshape(B, S, H)


def embeddings_ref(input_ids, segment_ids, word_table, proj, pos_table,
                   type_table, gamma, beta):
    B, S = input_ids.shape
    position_ids = jnp.broadcast_to(jnp.arange(S)[None, :], (B, S))
    w = word_table[input_ids] @ proj
    x = w + pos_table[position_ids] + type_table[segment_ids]
    mean = x.mean(-1, keepdims=True)
    var = ((x - mean) ** 2).mean(-1, keepdims=True)
    y = (x - mean) / jnp.sqrt(var + EPS)
    return y * gamma.reshape(1, 1, -1) + beta.reshape(1, 1, -1)


if __name__ == "__main__":
    key = jax.random.PRNGKey(0)
    k_ids, k_seg, k_w, k_l, k_p, k_t, k_g, k_b = jax.random.split(key, 8)

    B, S = 2, MAX_POS
    input_ids = jax.random.randint(k_ids, (B, S), 0, VOCAB, dtype=jnp.int32)
    segment_ids = jax.random.randint(k_seg, (B, S), 0, NUM_TYPES, dtype=jnp.int32)

    # Deterministic parameter init (synthetic; mirrors __init__ shapes).
    word_table = 0.02 * jax.random.normal(k_w, (VOCAB, WORD_DIM), jnp.float32)
    word_table = word_table.at[0].set(0.0)           # padding_idx=0 row is zero
    lin_w = 0.02 * jax.random.normal(k_l, (HIDDEN, WORD_DIM), jnp.float32)  # nn.Linear weight (out,in)
    proj = lin_w.T                                    # (128, hidden) for x @ W^T
    pos_table = 0.02 * jax.random.normal(k_p, (MAX_POS, HIDDEN), jnp.float32)
    type_table = 0.02 * jax.random.normal(k_t, (NUM_TYPES, HIDDEN), jnp.float32)
    gamma = 1.0 + 0.1 * jax.random.normal(k_g, (HIDDEN,), jnp.float32)  # LayerNorm weight (torch 1-D)
    beta = 0.1 * jax.random.normal(k_b, (HIDDEN,), jnp.float32)         # LayerNorm bias

    out = embeddings_forward(input_ids, segment_ids, word_table, proj,
                             pos_table, type_table, gamma, beta)
    out = jax.block_until_ready(out)

    ref = embeddings_ref(input_ids, segment_ids, word_table, proj,
                         pos_table, type_table, gamma, beta)
    np.testing.assert_allclose(np.asarray(out), np.asarray(ref),
                               rtol=1e-4, atol=1e-4)
    print("KERNEL_OK")
</pallas_src>

<mosaic_0001>
module attributes {stable_mosaic.version = 11 : i64} {
  func.func @embeddings_kernel(%arg0: i32, %arg1: memref<32x1xi32, #tpu.memory_space<vmem>>, %arg2: memref<32x1xi32, #tpu.memory_space<vmem>>, %arg3: memref<32x1xi32, #tpu.memory_space<vmem>>, %arg4: memref<64x128xf32, #tpu.memory_space<vmem>>, %arg5: memref<128x128xf32, #tpu.memory_space<vmem>>, %arg6: memref<16x128xf32, #tpu.memory_space<vmem>>, %arg7: memref<3x128xf32, #tpu.memory_space<vmem>>, %arg8: memref<1x128xf32, #tpu.memory_space<vmem>>, %arg9: memref<1x128xf32, #tpu.memory_space<vmem>>, %arg10: memref<32x128xf32, #tpu.memory_space<vmem>>) attributes {dimension_semantics = [#tpu.dimension_semantics<arbitrary>], iteration_bounds = array<i64: 1>, scalar_prefetch = 0 : i64, scratch_operands = 0 : i64, tpu.core_type = #tpu.core_type<tc>, window_params = [{pipeline_mode = #tpu.pipeline_mode<synchronous>, transform_indices = @transform_0, window_bounds = array<i64: 32, 1>}, {pipeline_mode = #tpu.pipeline_mode<synchronous>, transform_indices = @transform_1, window_bounds = array<i64: 32, 1>}, {pipeline_mode = #tpu.pipeline_mode<synchronous>, transform_indices = @transform_2, window_bounds = array<i64: 32, 1>}, {pipeline_mode = #tpu.pipeline_mode<synchronous>, transform_indices = @transform_3, window_bounds = array<i64: 64, 128>}, {pipeline_mode = #tpu.pipeline_mode<synchronous>, transform_indices = @transform_4, window_bounds = array<i64: 128, 128>}, {pipeline_mode = #tpu.pipeline_mode<synchronous>, transform_indices = @transform_5, window_bounds = array<i64: 16, 128>}, {pipeline_mode = #tpu.pipeline_mode<synchronous>, transform_indices = @transform_6, window_bounds = array<i64: 3, 128>}, {pipeline_mode = #tpu.pipeline_mode<synchronous>, transform_indices = @transform_7, window_bounds = array<i64: 1, 128>}, {pipeline_mode = #tpu.pipeline_mode<synchronous>, transform_indices = @transform_8, window_bounds = array<i64: 1, 128>}, {pipeline_mode = #tpu.pipeline_mode<synchronous>, transform_indices = @transform_9, window_bounds = array<i64: 32, 128>}]} {
    %c0 = arith.constant 0 : index
    %c0_0 = arith.constant 0 : index
    %0 = vector.load %arg1[%c0, %c0_0] : memref<32x1xi32, #tpu.memory_space<vmem>>, vector<32x1xi32>
    %c0_1 = arith.constant 0 : index
    %c0_2 = arith.constant 0 : index
    %1 = vector.load %arg2[%c0_1, %c0_2] : memref<32x1xi32, #tpu.memory_space<vmem>>, vector<32x1xi32>
    %c0_3 = arith.constant 0 : index
    %c0_4 = arith.constant 0 : index
    %2 = vector.load %arg3[%c0_3, %c0_4] : memref<32x1xi32, #tpu.memory_space<vmem>>, vector<32x1xi32>
    %3 = tpu.iota {dimensions = array<i32: 1>} : vector<32x64xi32>
    %4 = vector.broadcast %0 : vector<32x1xi32> to vector<32x64xi32>
    %5 = arith.cmpi eq, %4, %3 : vector<32x64xi32>
    %6 = arith.extui %5 : vector<32x64xi1> to vector<32x64xi32>
    %7 = arith.sitofp %6 : vector<32x64xi32> to vector<32x64xf32>
    %c0_5 = arith.constant 0 : index
    %c0_6 = arith.constant 0 : index
    %8 = vector.load %arg4[%c0_5, %c0_6] : memref<64x128xf32, #tpu.memory_space<vmem>>, vector<64x128xf32>
    %cst = arith.constant dense<0.000000e+00> : vector<32x128xf32>
    %9 = tpu.matmul %7, %8, %cst {dimension_numbers = #tpu.dot_dimension_numbers<[1], [0], [0], [1], [0, 0, 1, 1], [], []>} : vector<32x64xf32>, vector<64x128xf32>, vector<32x128xf32> -> vector<32x128xf32>
    %c0_7 = arith.constant 0 : index
    %c0_8 = arith.constant 0 : index
    %10 = vector.load %arg5[%c0_7, %c0_8] : memref<128x128xf32, #tpu.memory_space<vmem>>, vector<128x128xf32>
    %cst_9 = arith.constant dense<0.000000e+00> : vector<32x128xf32>
    %11 = tpu.matmul %9, %10, %cst_9 {dimension_numbers = #tpu.dot_dimension_numbers<[1], [0], [0], [1], [0, 0, 1, 1], [], []>} : vector<32x128xf32>, vector<128x128xf32>, vector<32x128xf32> -> vector<32x128xf32>
    %12 = tpu.iota {dimensions = array<i32: 1>} : vector<32x16xi32>
    %13 = vector.broadcast %2 : vector<32x1xi32> to vector<32x16xi32>
    %14 = arith.cmpi eq, %13, %12 : vector<32x16xi32>
    %15 = arith.extui %14 : vector<32x16xi1> to vector<32x16xi32>
    %16 = arith.sitofp %15 : vector<32x16xi32> to vector<32x16xf32>
    %c0_10 = arith.constant 0 : index
    %c0_11 = arith.constant 0 : index
    %17 = vector.load %arg6[%c0_10, %c0_11] : memref<16x128xf32, #tpu.memory_space<vmem>>, vector<16x128xf32>
    %cst_12 = arith.constant dense<0.000000e+00> : vector<32x128xf32>
    %18 = tpu.matmul %16, %17, %cst_12 {dimension_numbers = #tpu.dot_dimension_numbers<[1], [0], [0], [1], [0, 0, 1, 1], [], []>} : vector<32x16xf32>, vector<16x128xf32>, vector<32x128xf32> -> vector<32x128xf32>
    %c0_13 = arith.constant 0 : index
    %c0_14 = arith.constant 0 : index
    %19 = vector.load %arg7[%c0_13, %c0_14] : memref<3x128xf32, #tpu.memory_space<vmem>>, vector<1x128xf32>
    %c1 = arith.constant 1 : index
    %c0_15 = arith.constant 0 : index
    %20 = vector.load %arg7[%c1, %c0_15] : memref<3x128xf32, #tpu.memory_space<vmem>>, vector<1x128xf32>
    %c2 = arith.constant 2 : index
    %c0_16 = arith.constant 0 : index
    %21 = vector.load %arg7[%c2, %c0_16] : memref<3x128xf32, #tpu.memory_space<vmem>>, vector<1x128xf32>
    %c0_i32 = arith.constant 0 : i32
    %22 = vector.broadcast %c0_i32 : i32 to vector<32x1xi32>
    %23 = arith.cmpi eq, %1, %22 : vector<32x1xi32>
    %c1_i32 = arith.constant 1 : i32
    %24 = vector.broadcast %c1_i32 : i32 to vector<32x1xi32>
    %25 = arith.cmpi eq, %1, %24 : vector<32x1xi32>
    %26 = vector.shape_cast %25 : vector<32x1xi1> to vector<32x1xi1>
    %27 = vector.broadcast %26 : vector<32x1xi1> to vector<32x128xi1>
    %28 = vector.shape_cast %20 : vector<1x128xf32> to vector<1x128xf32>
    %29 = vector.broadcast %28 : vector<1x128xf32> to vector<32x128xf32>
    %30 = vector.shape_cast %21 : vector<1x128xf32> to vector<1x128xf32>
    %31 = vector.broadcast %30 : vector<1x128xf32> to vector<32x128xf32>
    %32 = arith.select %27, %29, %31 : vector<32x128xi1>, vector<32x128xf32>
    %33 = vector.shape_cast %23 : vector<32x1xi1> to vector<32x1xi1>
    %34 = vector.broadcast %33 : vector<32x1xi1> to vector<32x128xi1>
    %35 = vector.shape_cast %19 : vector<1x128xf32> to vector<1x128xf32>
    %36 = vector.broadcast %35 : vector<1x128xf32> to vector<32x128xf32>
    %37 = arith.select %34, %36, %32 : vector<32x128xi1>, vector<32x128xf32>
    %38 = arith.addf %11, %18 : vector<32x128xf32>
    %39 = arith.addf %38, %37 : vector<32x128xf32>
    %cst_17 = arith.constant dense<0.000000e+00> : vector<32xf32>
    %40 = vector.multi_reduction <add>, %39, %cst_17 [1] : vector<32x128xf32> to vector<32xf32>
    %41 = vector.shape_cast %40 : vector<32xf32> to vector<32x1xf32>
    %cst_18 = arith.constant 1.280000e+02 : f32
    %42 = vector.broadcast %cst_18 : f32 to vector<32x1xf32>
    %43 = arith.divf %41, %42 : vector<32x1xf32>
    %44 = vector.broadcast %43 : vector<32x1xf32> to vector<32x128xf32>
    %45 = arith.subf %39, %44 : vector<32x128xf32>
    %46 = arith.mulf %45, %45 : vector<32x128xf32>
    %cst_19 = arith.constant dense<0.000000e+00> : vector<32xf32>
    %47 = vector.multi_reduction <add>, %46, %cst_19 [1] : vector<32x128xf32> to vector<32xf32>
    %48 = vector.shape_cast %47 : vector<32xf32> to vector<32x1xf32>
    %cst_20 = arith.constant 1.280000e+02 : f32
    %49 = vector.broadcast %cst_20 : f32 to vector<32x1xf32>
    %50 = arith.divf %48, %49 : vector<32x1xf32>
    %51 = vector.broadcast %43 : vector<32x1xf32> to vector<32x128xf32>
    %52 = arith.subf %39, %51 : vector<32x128xf32>
    %cst_21 = arith.constant 9.99999996E-13 : f32
    %53 = vector.broadcast %cst_21 : f32 to vector<32x1xf32>
    %54 = arith.addf %50, %53 : vector<32x1xf32>
    %55 = math.rsqrt %54 : vector<32x1xf32>
    %56 = vector.broadcast %55 : vector<32x1xf32> to vector<32x128xf32>
    %57 = arith.mulf %52, %56 : vector<32x128xf32>
    %c0_22 = arith.constant 0 : index
    %c0_23 = arith.constant 0 : index
    %58 = vector.load %arg8[%c0_22, %c0_23] : memref<1x128xf32, #tpu.memory_space<vmem>>, vector<1x128xf32>
    %59 = vector.broadcast %58 : vector<1x128xf32> to vector<32x128xf32>
    %60 = arith.mulf %57, %59 : vector<32x128xf32>
    %c0_24 = arith.constant 0 : index
    %c0_25 = arith.constant 0 : index
    %61 = vector.load %arg9[%c0_24, %c0_25] : memref<1x128xf32, #tpu.memory_space<vmem>>, vector<1x128xf32>
    %62 = vector.broadcast %61 : vector<1x128xf32> to vector<32x128xf32>
    %63 = arith.addf %60, %62 : vector<32x128xf32>
    %c0_26 = arith.constant 0 : index
    %c0_27 = arith.constant 0 : index
    %64 = vector.load %arg10[%c0_26, %c0_27] : memref<32x128xf32, #tpu.memory_space<vmem>>, vector<32x128xf32>
    tpu.vector_store %arg10[%c0_26, %c0_27], %63 {strides = array<i32>} : memref<32x128xf32, #tpu.memory_space<vmem>>, vector<32x128xf32>,
    return
  }
  func.func @transform_0(%arg0: i32) -> (i32, i32) {
    %c0_i32 = arith.constant 0 : i32
    %c0_i32_0 = arith.constant 0 : i32
    %c0_i32_1 = arith.constant 0 : i32
    return %c0_i32, %c0_i32_0 : i32, i32
  }
  func.func @transform_1(%arg0: i32) -> (i32, i32) {
    %c0_i32 = arith.constant 0 : i32
    %c0_i32_0 = arith.constant 0 : i32
    %c0_i32_1 = arith.constant 0 : i32
    return %c0_i32, %c0_i32_0 : i32, i32
  }
  func.func @transform_2(%arg0: i32) -> (i32, i32) {
    %c0_i32 = arith.constant 0 : i32
    %c0_i32_0 = arith.constant 0 : i32
    %c0_i32_1 = arith.constant 0 : i32
    return %c0_i32, %c0_i32_0 : i32, i32
  }
  func.func @transform_3(%arg0: i32) -> (i32, i32) {
    %c0_i32 = arith.constant 0 : i32
    %c0_i32_0 = arith.constant 0 : i32
    %c0_i32_1 = arith.constant 0 : i32
    return %c0_i32, %c0_i32_0 : i32, i32
  }
  func.func @transform_4(%arg0: i32) -> (i32, i32) {
    %c0_i32 = arith.constant 0 : i32
    %c0_i32_0 = arith.constant 0 : i32
    %c0_i32_1 = arith.constant 0 : i32
    return %c0_i32, %c0_i32_0 : i32, i32
  }
  func.func @transform_5(%arg0: i32) -> (i32, i32) {
    %c0_i32 = arith.constant 0 : i32
    %c0_i32_0 = arith.constant 0 : i32
    %c0_i32_1 = arith.constant 0 : i32
    return %c0_i32, %c0_i32_0 : i32, i32
  }
  func.func @transform_6(%arg0: i32) -> (i32, i32) {
    %c0_i32 = arith.constant 0 : i32
    %c0_i32_0 = arith.constant 0 : i32
    %c0_i32_1 = arith.constant 0 : i32
    return %c0_i32, %c0_i32_0 : i32, i32
  }
  func.func @transform_7(%arg0: i32) -> (i32, i32) {
    %c0_i32 = arith.constant 0 : i32
    %c0_i32_0 = arith.constant 0 : i32
    %c0_i32_1 = arith.constant 0 : i32
    return %c0_i32, %c0_i32_0 : i32, i32
  }
  func.func @transform_8(%arg0: i32) -> (i32, i32) {
    %c0_i32 = arith.constant 0 : i32
    %c0_i32_0 = arith.constant 0 : i32
    %c0_i32_1 = arith.constant 0 : i32
    return %c0_i32, %c0_i32_0 : i32, i32
  }
  func.func @transform_9(%arg0: i32) -> (i32, i32) {
    %c0_i32 = arith.constant 0 : i32
    %c0_i32_0 = arith.constant 0 : i32
    %c0_i32_1 = arith.constant 0 : i32
    return %c0_i32, %c0_i32_0 : i32, i32
  }
}

</mosaic_0001>

<bundles_post_ra>
// kernel: tpu_custom_call.1
= control target key start
LH: loop header
LB: loop body
LE: loop exit
PB: predicated region body
PF: predicated region fallthrough
CT: control target
= control target key end

     0   :  { %14 = vsyncpa [#allocation3], 0  ;;  %s1013_s0 = inlined_call_operand.vmem [shape: s32[32,1], index: 0, kind: input, shape index: {}]   ;;  %s1014_s1 = inlined_call_operand.vmem [shape: s32[32,1], index: 1, kind: input, shape index: {}]   ;;  %s1015_s2 = inlined_call_operand.vmem [shape: s32[32,1], index: 2, kind: input, shape index: {}]   ;;  %s1016_s3 = inlined_call_operand.vmem [shape: f32[64,128], index: 3, kind: input, shape index: {}]   ;;  %s1017_s4 = inlined_call_operand.hbm [shape: f32[128,128], index: 4, kind: input, shape index: {}]   ;;  %s1018_s5 = inlined_call_operand.vmem [shape: f32[16,128], index: 5, kind: input, shape index: {}]   ;;  %s1019_s6 = inlined_call_operand.vmem [shape: f32[3,128], index: 6, kind: input, shape index: {}]   ;;  %s1020_s7 = inlined_call_operand.vmem [shape: f32[1,128], index: 7, kind: input, shape index: {}]   ;;  %s1021_s8 = inlined_call_operand.vmem [shape: f32[1,128], index: 8, kind: input, shape index: {}]   ;;  %s1022_s9 = inlined_call_operand.hbm [shape: f32[32,128], index: 9, kind: output, shape index: {}]  }
   0x1   :  { %15 = vsyncpa [#allocation4], 0  ;;  %s828_s30 = smov [#allocation2]   ;;  %s780_s13 = scalar_lea.hbm %s1017_s4, 2048 }
   0x2   :  { %s29_s10 = sshll.u32 %s828_s30, 4  ;;  %p781_p0 = scmp.ne.s32.totalorder %s1017_s4, %s780_s13  ;;  %s30_s10 = int_to_ptr.vmem [resolvable:$true] %s29_s10 }
   0x3   :  { %p784_p1 = scmp.lt.u32.totalorder %s780_s13, %s1017_s4 }
   0x5   :  { %p786_p2 = pnand %p784_p1, %p781_p0 }
   0x7   :  { %789 = shalt.err (!%p786_p2)
}
   0x8   :  { %s790_s18 = scalar_lea.vmem %s30_s10, 2048  ;;  %p795_p4 = scmp.lt.s32.totalorder %s30_s10, %s30_s10 }
   0x9   :  { %p791_p3 = scmp.ne.s32.totalorder %s30_s10, %s790_s18  ;;  %p796_p5 = scmp.lt.s32.totalorder %s790_s18, %s790_s18 }
   0xb   :  { %p797_p6 = por %p796_p5, %p795_p4 }
   0xd   :  { %p798_p7 = pnand %p797_p6, %p791_p3 }
   0xf   :  { %801 = shalt.err (!%p798_p7)
}
  0x10   :  { %s829_s19 = smov 128   ;;  %s830_s20 = smov 8  }
  0x11   :  { %35 = dma.hbm_to_vmem [thread:$0]  %s1017_s4, 2048, %s30_s10, [#allocation3], %s829_s19, %s829_s19, %s830_s20  }
  0x12   :  { %824 = dma.done.wait [#allocation3], 2048  }
  0x13   :  { %825 = vsyncadd [#allocation3], 4294965248  ;;  %v831_v0 = vmov 0   ;;  %v49_v1 = vld [vmem:[%s1013_s0 + $0x10] sm:$0xff]  ;;  %v47_v2 = vld [vmem:[%s1013_s0] sm:$0xff]  ;;  %v59_v60 = vlaneseq  ;;  %vm93_vm8 = vcmask 523264  }
  0x14   :  { %771 = vset.pattern.permute.xlu1 %v831_v0  ;;  %770 = vset.pattern.permute.xlu0 %v831_v0  ;;  %v50_v3 = vld [vmem:[%s1013_s0 + $0x18] sm:$0xff]  ;;  %v48_v4 = vld [vmem:[%s1013_s0 + $0x8] sm:$0xff]  ;;  %v85_v5 = vld [vmem:[%s1016_s3] sm:$0xff]  ;;  %vm233_vm14 = vcmask 130048  }
  0x15   :  { %68 = vperm.xlu1 %771, %v49_v1   ;;  %62 = vperm.xlu0 %770, %v47_v2   ;;  %v86_v6 = vld [vmem:[%s1016_s3 + $0x8] sm:$0xff]  ;;  %v87_v7 = vld [vmem:[%s1016_s3 + $0x10] sm:$0xff]  ;;  %v88_v8 = vld [vmem:[%s1016_s3 + $0x18] sm:$0xff]  ;;  %v60_v61 = vand.u32 127, %v59_v60 }
  0x16   :  { %v56_v9 = vld [vmem:[%s1015_s2 + $0x8] sm:$0xff]  ;;  %v55_v10 = vld [vmem:[%s1015_s2] sm:$0xff]  ;;  %v708_v11 = vpack.c.bf16 %v86_v6, %v85_v5  ;;  %v712_v13 = vpack.c.bf16 %v88_v8, %v87_v7  ;;  %v58_v17 = vld [vmem:[%s1015_s2 + $0x18] sm:$0xff] }
  0x17   :  { %v52_v12 = vld [vmem:[%s1014_s1 + $0x8] sm:$0xff]  ;;  %v51_v14 = vld [vmem:[%s1014_s1] sm:$0xff]  ;;  %v57_v18 = vld [vmem:[%s1015_s2 + $0x10] sm:$0xff] }
  0x18   :  { %709 = vmatprep.subr.bf16.mxu0 %v708_v11  ;;  %v89_v15 = vld [vmem:[%s1016_s3 + $0x20] sm:$0xff]  ;;  %v90_v16 = vld [vmem:[%s1016_s3 + $0x28] sm:$0xff]  ;;  %vm339_vm0 = vcmp.eq.s32.totalorder %v52_v12, 1  ;;  %vm338_vm1 = vcmp.eq.s32.totalorder %v51_v14, 1  ;;  %v54_v19 = vld [vmem:[%s1014_s1 + $0x18] sm:$0xff]  ;;  %vm335_vm4 = vcmp.eq.s32.totalorder %v52_v12, 0 }
  0x19   :  { %71 = vperm.xlu1 %771, %v50_v3   ;;  %65 = vperm.xlu0 %770, %v48_v4   ;;  %v716_v20 = vpack.c.bf16 %v90_v16, %v89_v15  ;;  %v53_v21 = vld [vmem:[%s1014_s1 + $0x10] sm:$0xff]  ;;  %v92_v23 = vld [vmem:[%s1016_s3 + $0x38] sm:$0xff]  ;;  %v343_v24 = vsel %vm339_vm0, 1, %v831_v0  ;;  %v342_v25 = vsel %vm338_vm1, 1, %v831_v0  ;;  %vm341_vm2 = vcmp.eq.s32.totalorder %v54_v19, 1  ;;  %v231_v27 = vld [vmem:[%s1018_s5] sm:$0xff] }
  0x1a   :  { %711 = vmatpush3.bf16.msra.mxu0 %v708_v11  ;;  %v91_v22 = vld [vmem:[%s1016_s3 + $0x30] sm:$0xff]  ;;  %vm340_vm3 = vcmp.eq.s32.totalorder %v53_v21, 1  ;;  %v232_v28 = vld [vmem:[%s1018_s5 + $0x8] sm:$0xff]  ;;  %v345_v29 = vsel %vm341_vm2, 1, %v831_v0  ;;  %vm334_vm5 = vcmp.eq.s32.totalorder %v51_v14, 0  ;;  %v375_v32 = vsel %vm335_vm4, 1, %v831_v0 }
  0x1b   :  { %713 = vmatprep.subr.bf16.mxu0 %v712_v13  ;;  %v720_v26 = vpack.c.bf16 %v92_v23, %v91_v22  ;;  %v344_v30 = vsel %vm340_vm3, 1, %v831_v0  ;;  %v971_v31 = vpack.c.bf16 %v232_v28, %v231_v27  ;;  %v374_v33 = vsel %vm334_vm5, 1, %v831_v0  ;;  %v191_v36 = vld [vmem:[#allocation2] sm:$0xff]  ;;  %v192_v37 = vld [vmem:[#allocation2 + $0x8] sm:$0xff]  ;;  %v193_v38 = vld [vmem:[#allocation2 + $0x10] sm:$0xff] }
  0x1c   :  { %vm337_vm6 = vcmp.eq.s32.totalorder %v54_v19, 0  ;;  %vm336_vm7 = vcmp.eq.s32.totalorder %v53_v21, 0  ;;  %v728_v39 = vpack.c.bf16 %v192_v37, %v191_v36  ;;  %v194_v40 = vld [vmem:[#allocation2 + $0x18] sm:$0xff]  ;;  %v195_v42 = vld [vmem:[#allocation2 + $0x20] sm:$0xff]  ;;  %v196_v43 = vld [vmem:[#allocation2 + $0x28] sm:$0xff] }
  0x1d   :  { %211 = vperm.xlu1 %771, %v56_v9   ;;  %208 = vperm.xlu0 %770, %v55_v10   ;;  %v377_v34 = vsel %vm337_vm6, 1, %v831_v0  ;;  %v376_v35 = vsel %vm336_vm7, 1, %v831_v0  ;;  %v732_v41 = vpack.c.bf16 %v194_v40, %v193_v38  ;;  %v736_v44 = vpack.c.bf16 %v196_v43, %v195_v42  ;;  %v197_v45 = vld [vmem:[#allocation2 + $0x30] sm:$0xff]  ;;  %v198_v46 = vld [vmem:[#allocation2 + $0x38] sm:$0xff]  ;;  %v199_v48 = vld [vmem:[#allocation2 + $0x40] sm:$0xff] }
  0x1e   :  { %715 = vmatpush3.bf16.msra.mxu0 %v712_v13  ;;  %729 = vmatprep.subr.bf16.mxu1 %v728_v39  ;;  %v740_v47 = vpack.c.bf16 %v198_v46, %v197_v45  ;;  %v200_v49 = vld [vmem:[#allocation2 + $0x48] sm:$0xff]  ;;  %v201_v51 = vld [vmem:[#allocation2 + $0x50] sm:$0xff]  ;;  %v202_v52 = vld [vmem:[#allocation2 + $0x58] sm:$0xff]  ;;  %v832_v0 = vmov 0.0  }
  0x1f   :  { %717 = vmatprep.subr.bf16.mxu0 %v716_v20  ;;  %731 = vmatpush3.bf16.msra.mxu1 %v728_v39  ;;  %v744_v50 = vpack.c.bf16 %v200_v49, %v199_v48  ;;  %v748_v53 = vpack.c.bf16 %v202_v52, %v201_v51  ;;  %v203_v54 = vld [vmem:[#allocation2 + $0x60] sm:$0xff]  ;;  %v204_v55 = vld [vmem:[#allocation2 + $0x68] sm:$0xff]  ;;  %v205_v57 = vld [vmem:[#allocation2 + $0x70] sm:$0xff] }
  0x20   :  { %733 = vmatprep.subr.bf16.mxu1 %v732_v41  ;;  %v752_v56 = vpack.c.bf16 %v204_v55, %v203_v54  ;;  %v206_v58 = vld [vmem:[#allocation2 + $0x78] sm:$0xff] }
  0x21   :  { %217 = vperm.xlu1 %771, %v58_v17   ;;  %214 = vperm.xlu0 %770, %v57_v18   ;;  %v756_v59 = vpack.c.bf16 %v206_v58, %v205_v57 }
  0x22   :  { %719 = vmatpush3.bf16.msra.mxu0 %v716_v20 }
  0x23   :  { %721 = vmatprep.subr.bf16.mxu0 %v720_v26  ;;  %735 = vmatpush3.bf16.msra.mxu1 %v732_v41 }
  0x24   :  { %737 = vmatprep.subr.bf16.mxu1 %v736_v44 }
  0x25   :  { %350 = vperm.xlu1 %771, %v343_v24   ;;  %347 = vperm.xlu0 %770, %v342_v25  }
  0x26   :  { %723 = vmatpush3.bf16.msra.mxu0 %v720_v26 }
  0x27   :  { %725 = vmatprep.subr.bf16.mxu0 %v971_v31  ;;  %739 = vmatpush3.bf16.msra.mxu1 %v736_v44 }
  0x28   :  { %741 = vmatprep.subr.bf16.mxu1 %v740_v47 }
  0x29   :  { %356 = vperm.xlu1 %771, %v345_v29   ;;  %353 = vperm.xlu0 %770, %v344_v30   ;;  %v595_v29 = vld [vmem:[%s1019_s6 + $0x1] ss:$0 sm:$0xff]  ;;  %v596_v30 = vld [vmem:[%s1019_s6 + $0x2] ss:$0 sm:$0xff] }
  0x2b   :  { %743 = vmatpush3.bf16.msra.mxu1 %v740_v47 }
  0x2c   :  { %745 = vmatprep.subr.bf16.mxu1 %v744_v50 }
  0x2d   :  { %382 = vperm.xlu1 %771, %v375_v32   ;;  %379 = vperm.xlu0 %770, %v374_v33  }
  0x2f   :  { %747 = vmatpush3.bf16.msra.mxu1 %v744_v50 }
  0x30   :  { %749 = vmatprep.subr.bf16.mxu1 %v748_v53 }
  0x31   :  { %388 = vperm.xlu1 %771, %v377_v34   ;;  %385 = vperm.xlu0 %770, %v376_v35  }
  0x33   :  { %751 = vmatpush3.bf16.msra.mxu1 %v748_v53 }
  0x34   :  { %753 = vmatprep.subr.bf16.mxu1 %v752_v56 }
  0x37   :  { %755 = vmatpush3.bf16.msra.mxu1 %v752_v56 }
  0x38   :  { %757 = vmatprep.subr.bf16.mxu1 %v756_v59 }
  0x3b   :  { %759 = vmatpush3.bf16.msra.mxu1 %v756_v59 }
  0x94   :  { %v69_v62 = vpop.permute.xlu1 %68  ;;  %v63_v63 = vpop.permute.xlu0 %62 }
  0x95   :  { %vm73_vm9 = vcmp.eq.s32.totalorder %v63_v63, %v60_v61  ;;  %vm75_vm10 = vcmp.eq.s32.totalorder %v69_v62, %v60_v61 }
  0x96   :  { %v579_v1 = vsel %vm73_vm9, 1.0, %v832_v0  ;;  %v581_v4 = vsel %vm75_vm10, 1.0, %v832_v0 }
  0x97   :  { %654 = vmatprep.mubr.msk.f32.mxu0 %vm93_vm8, %v579_v1 }
  0x98   :  { %v72_v2 = vpop.permute.xlu1 %71  ;;  %v66_v3 = vpop.permute.xlu0 %65 }
  0x99   :  { %vm74_vm11 = vcmp.eq.s32.totalorder %v66_v3, %v60_v61  ;;  %vm76_vm12 = vcmp.eq.s32.totalorder %v72_v2, %v60_v61 }
  0x9a   :  { %v580_v5 = vsel %vm74_vm11, 1.0, %v832_v0  ;;  %v582_v8 = vsel %vm76_vm12, 1.0, %v832_v0 }
  0x9b   :  { %655 = vmatmul.mubr.msk.f32.vlgmr.msra.gmra.mrb[0].mxu0 %vm93_vm8, %v580_v5 }
  0x9c   :  { %v212_v6 = vpop.permute.xlu1 %211  ;;  %657 = vmatprep.mubr.msk.f32.mxu0 %vm93_vm8, %v581_v4  ;;  %v209_v7 = vpop.permute.xlu0 %208  ;;  %727 = vmatpush3.bf16.msra.mxu0 %v971_v31  ;;  %v597_v31 = vld [vmem:[%s1019_s6] ss:$0 sm:$0xff] }
  0x9d   :  { %vm219_vm13 = vcmp.eq.s32.totalorder %v209_v7, %v60_v61  ;;  %vm220_vm15 = vcmp.eq.s32.totalorder %v212_v6, %v60_v61 }
  0x9e   :  { %v587_v9 = vsel %vm219_vm13, 1.0, %v832_v0  ;;  %v588_v12 = vsel %vm220_vm15, 1.0, %v832_v0 }
  0x9f   :  { %658 = vmatmul.mubr.msk.f32.gmra.mrb[2].mxu0 %vm93_vm8, %v582_v8 }
  0xa0   :  { %v218_v10 = vpop.permute.xlu1 %217  ;;  %664 = vmatprep.mubr.msk.f32.mxu0 %vm233_vm14, %v587_v9  ;;  %v215_v11 = vpop.permute.xlu0 %214 }
  0xa1   :  { %vm221_vm0 = vcmp.eq.s32.totalorder %v215_v11, %v60_v61  ;;  %vm222_vm1 = vcmp.eq.s32.totalorder %v218_v10, %v60_v61 }
  0xa2   :  { %v589_v13 = vsel %vm221_vm0, 1.0, %v832_v0  ;;  %v590_v14 = vsel %vm222_vm1, 1.0, %v832_v0 }
  0xa3   :  { %665 = vmatmul.mubr.msk.f32.vlgmr.msra.gmra.mrb[4].mxu0 %vm233_vm14, %v588_v12 }
  0xa4   :  { %667 = vmatprep.mubr.msk.f32.mxu0 %vm233_vm14, %v589_v13  ;;  %v348_v23 = vpop.permute.xlu0 %347  ;;  %v351_v24 = vpop.permute.xlu1 %350 }
  0xa5   :  { %vm359_vm2 = vcmp.eq.s32.totalorder %v351_v24, 1  ;;  %vm358_vm3 = vcmp.eq.s32.totalorder %v348_v23, 1  ;;  %v599_v23 = vld [vmem:[%s1021_s8] ss:$0 sm:$0xff] }
  0xa6   :  { %v371_v33 = vsel %vm359_vm2, %v595_v29, %v596_v30  ;;  %v370_v37 = vsel %vm358_vm3, %v595_v29, %v596_v30 }
  0xa7   :  { %668 = vmatmul.mubr.msk.f32.gmra.mrb[6].mxu0 %vm233_vm14, %v590_v14 }
  0xa8   :  { %v354_v25 = vpop.permute.xlu0 %353  ;;  %v357_v26 = vpop.permute.xlu1 %356 }
  0xa9   :  { %vm360_vm6 = vcmp.eq.s32.totalorder %v354_v25, 1  ;;  %vm361_vm8 = vcmp.eq.s32.totalorder %v357_v26, 1 }
  0xaa   :  { %v372_v47 = vsel %vm360_vm6, %v595_v29, %v596_v30  ;;  %v373_v51 = vsel %vm361_vm8, %v595_v29, %v596_v30 }
  0xac   :  { %v380_v27 = vpop.permute.xlu0 %379  ;;  %v383_v28 = vpop.permute.xlu1 %382 }
  0xad   :  { %vm391_vm4 = vcmp.eq.s32.totalorder %v383_v28, 1  ;;  %vm390_vm5 = vcmp.eq.s32.totalorder %v380_v27, 1 }
  0xae   :  { %v399_v39 = vsel %vm391_vm4, %v597_v31, %v371_v33  ;;  %v398_v41 = vsel %vm390_vm5, %v597_v31, %v370_v37 }
  0xb0   :  { %v386_v34 = vpop.permute.xlu0 %385  ;;  %v389_v44 = vpop.permute.xlu1 %388 }
  0xb1   :  { %vm392_vm7 = vcmp.eq.s32.totalorder %v386_v34, 1  ;;  %vm393_vm9 = vcmp.eq.s32.totalorder %v389_v44, 1 }
  0xb2   :  { %v400_v49 = vsel %vm392_vm7, %v597_v31, %v372_v47  ;;  %v401_v52 = vsel %vm393_vm9, %v597_v31, %v373_v51 }
 0x16e   :  { %v656_v15 = vpop.f32.mrb[0].mxu0 }
 0x16f   :  { %v172_v16 = vpop.f32.mrb[1].mxu0 }
 0x170   :  { %702 = vmatprep.mubr.f32.mxu1 %v172_v16 }
 0x171   :  { %703 = vmatmul.mubr.f32.vlgmr.msra.gmra.mrb[0].mxu1 %v656_v15 }
 0x172   :  { %v659_v17 = vpop.f32.mrb[2].mxu0 }
 0x173   :  { %v182_v18 = vpop.f32.mrb[3].mxu0 }
 0x174   :  { %705 = vmatprep.mubr.f32.mxu1 %v182_v18 }
 0x175   :  { %706 = vmatmul.mubr.f32.gmra.mrb[2].mxu1 %v659_v17 }
 0x176   :  { %v666_v19 = vpop.f32.mrb[4].mxu0 }
 0x177   :  { %v312_v20 = vpop.f32.mrb[5].mxu0 }
 0x17a   :  { %v669_v21 = vpop.f32.mrb[6].mxu0 }
 0x17b   :  { %v322_v22 = vpop.f32.mrb[7].mxu0 }
 0x244   :  { %v704_v32 = vpop.f32.mrb[0].mxu1 }
 0x245   :  { %v474_v35 = vadd.f32 %v704_v32, %v666_v19  ;;  %v468_v36 = vpop.f32.mrb[1].mxu1  ;;  %v598_v19 = vld [vmem:[%s1020_s7] ss:$0 sm:$0xff]  ;;  %s833_s7 = smov [#allocation5]  }
 0x246   :  { %v469_v38 = vadd.f32 %v468_v36, %v312_v20  ;;  %s567_s29 = sshll.u32 %s833_s7, 4  ;;  %s568_s29 = int_to_ptr.vmem [resolvable:$true] %s567_s29 }
 0x247   :  { %v488_v40 = vadd.f32 %v474_v35, %v399_v39  ;;  %s802_s8 = scalar_lea.vmem %s568_s29, 512  ;;  %p807_p9 = scmp.lt.s32.totalorder %s568_s29, %s568_s29 }
 0x248   :  { %v707_v42 = vpop.f32.mrb[2].mxu1  ;;  %v487_v43 = vadd.f32 %v469_v38, %v398_v41  ;;  %p803_p8 = scmp.ne.s32.totalorder %s568_s29, %s802_s8  ;;  %p808_p10 = scmp.lt.s32.totalorder %s802_s8, %s802_s8 }
 0x249   :  { %v484_v45 = vadd.f32 %v707_v42, %v669_v21  ;;  %v478_v46 = vpop.f32.mrb[3].mxu1  ;;  %493 = vadd.xlane.f32.xlu1 %v488_v40 }
 0x24a   :  { %v479_v48 = vadd.f32 %v478_v46, %v322_v22  ;;  %491 = vadd.xlane.f32.xlu0 %v487_v43  ;;  %p809_p11 = por %p808_p10, %p807_p9 }
 0x24b   :  { %v490_v53 = vadd.f32 %v484_v45, %v401_v52 }
 0x24c   :  { %v489_v50 = vadd.f32 %v479_v48, %v400_v49  ;;  %p810_p12 = pnand %p809_p11, %p803_p8 }
 0x24e   :  { %495 = vadd.xlane.f32.xlu0 %v489_v50 }
 0x252   :  { %497 = vadd.xlane.f32.xlu0 %v490_v53 }
 0x2d6   :  { %v494_v54 = vpop.xlane.xlu1 %493 }
 0x2d7   :  { %v501_v55 = vmul.f32 0.0078125, %v494_v54  ;;  %v492_v56 = vpop.xlane.xlu0 %491 }
 0x2d8   :  { %v500_v57 = vmul.f32 0.0078125, %v492_v56 }
 0x2d9   :  { %v505_v58 = vsub.f32 %v488_v40, %v501_v55 }
 0x2da   :  { %v504_v59 = vsub.f32 %v487_v43, %v500_v57 }
 0x2db   :  { %v496_v60 = vpop.xlane.xlu0 %495  ;;  %v509_v61 = vmul.f32 %v505_v58, %v505_v58 }
 0x2dc   :  { %v502_v62 = vmul.f32 0.0078125, %v496_v60  ;;  %v508_v63 = vmul.f32 %v504_v59, %v504_v59 }
 0x2dd   :  { %514 = vadd.xlane.f32.xlu0 %v509_v61 }
 0x2de   :  { %v506_v0 = vsub.f32 %v489_v50, %v502_v62  ;;  %512 = vadd.xlane.f32.xlu1 %v508_v63 }
 0x2df   :  { %v498_v1 = vpop.xlane.xlu0 %497 }
 0x2e0   :  { %v503_v2 = vmul.f32 0.0078125, %v498_v1  ;;  %v510_v3 = vmul.f32 %v506_v0, %v506_v0 }
 0x2e2   :  { %v507_v4 = vsub.f32 %v490_v53, %v503_v2  ;;  %516 = vadd.xlane.f32.xlu1 %v510_v3 }
 0x2e4   :  { %v511_v5 = vmul.f32 %v507_v4, %v507_v4 }
 0x2e6   :  { %518 = vadd.xlane.f32.xlu0 %v511_v5 }
 0x36a   :  { %v515_v6 = vpop.xlane.xlu0 %514 }
 0x36b   :  { %v521_v7 = vmul.f32 0.0078125, %v515_v6  ;;  %v513_v8 = vpop.xlane.xlu1 %512 }
 0x36c   :  { %v520_v9 = vmul.f32 0.0078125, %v513_v8 }
 0x36d   :  { %v525_v10 = vadd.f32 1e-12, %v521_v7 }
 0x36e   :  { %v524_v11 = vadd.f32 1e-12, %v520_v9 }
 0x36f   :  { %772 = vrsqrt.f32 %v525_v10  ;;  %v517_v12 = vpop.xlane.xlu1 %516 }
 0x370   :  { %774 = vrsqrt.f32 %v524_v11  ;;  %v522_v13 = vmul.f32 0.0078125, %v517_v12 }
 0x372   :  { %v526_v14 = vadd.f32 1e-12, %v522_v13 }
 0x373   :  { %v519_v15 = vpop.xlane.xlu0 %518 }
 0x374   :  { %776 = vrsqrt.f32 %v526_v14  ;;  %v523_v16 = vmul.f32 0.0078125, %v519_v15 }
 0x376   :  { %v527_v17 = vadd.f32 1e-12, %v523_v16 }
 0x378   :  { %778 = vrsqrt.f32 %v527_v17 }
 0x379   :  { %v773_v18 = vpop.eup %772 }
 0x37a   :  { %v775_v20 = vpop.eup %774  ;;  %v533_v21 = vmul.f32 %v773_v18, %v505_v58 }
 0x37b   :  { %v532_v22 = vmul.f32 %v775_v20, %v504_v59 }
 0x37c   :  { %v544_v24 = vmul.f32 %v598_v19, %v533_v21 }
 0x37d   :  { %v543_v25 = vmul.f32 %v598_v19, %v532_v22 }
 0x37e   :  { %v777_v26 = vpop.eup %776  ;;  %v555_v27 = vadd.f32 %v599_v23, %v544_v24 }
 0x37f   :  { %v534_v28 = vmul.f32 %v777_v26, %v506_v0  ;;  %v554_v29 = vadd.f32 %v599_v23, %v543_v25 }
 0x380   :  { %559 = vst [vmem:[#allocation5 + $0x8] sm:$0xff] %v555_v27 }
 0x381   :  { %v545_v30 = vmul.f32 %v598_v19, %v534_v28  ;;  %558 = vst [vmem:[#allocation5] sm:$0xff] %v554_v29 }
 0x382   :  { %v779_v31 = vpop.eup %778 }
 0x383   :  { %v535_v32 = vmul.f32 %v779_v31, %v507_v4  ;;  %v556_v33 = vadd.f32 %v599_v23, %v545_v30 }
 0x385   :  { %v546_v34 = vmul.f32 %v598_v19, %v535_v32  ;;  %560 = vst [vmem:[#allocation5 + $0x10] sm:$0xff] %v556_v33 }
 0x387   :  { %v557_v35 = vadd.f32 %v599_v23, %v546_v34 }
 0x389   :  { %561 = vst [vmem:[#allocation5 + $0x18] sm:$0xff] %v557_v35 }
 0x38a   :  { %813 = shalt.err (!%p810_p12)
}
 0x38b   :  { %s814_s11 = scalar_lea.hbm %s1022_s9, 512 }
 0x38c   :  { %p815_p13 = scmp.ne.s32.totalorder %s1022_s9, %s814_s11  ;;  %p818_p0 = scmp.lt.u32.totalorder %s814_s11, %s1022_s9 }
 0x38e   :  { %p820_p1 = pnand %p818_p0, %p815_p13 }
 0x390   :  { %823 = shalt.err (!%p820_p1)
}
 0x391   :  { %573 = dma.vmem_to_hbm [thread:$0]  %s568_s29, 512, %s1022_s9, [#allocation4], %s829_s19, %s829_s19, %s830_s20  }
 0x392   :  { %826 = dma.done.wait [#allocation4], 512  }
 0x393   :  { %827 = vsyncadd [#allocation4], 4294966784 }
 0x394   :  { %577 = vsyncpa [#allocation3], 1 }
 0x395   :  { %578 = vsyncpa [#allocation4], 1 }

</bundles_post_ra>
